<compile_context>
chip_gen: v7x
topology: tpu7x:2x2x1
jax: 0.10.0
libtpu: 0.0.40
codegen_flags: <defaults>
</compile_context>

<pallas_src>
import functools

import jax
import jax.numpy as jnp
from jax.experimental import pallas as pl
from jax.experimental.pallas import tpu as pltpu


def _round_up(x, m):
    return ((x + m - 1) // m) * m


# ---------------------- tiled linear: y = x @ W_t + b -----------------------

def _linear_kernel(x_ref, w_ref, b_ref, o_ref):
    # W is stored pre-transposed as (in_dim, out_dim): feeds the MXU directly.
    y = jnp.dot(x_ref[...], w_ref[...], preferred_element_type=jnp.float32)
    o_ref[...] = (y + b_ref[...]).astype(o_ref.dtype)


def _pick_row_tile(n, target):
    if n <= target:
        return n
    return max(8, (target // 8) * 8)


def _pick_col_tile(out_dim, target):
    if out_dim <= target:
        return out_dim
    return max(128, (target // 128) * 128)


def linear(x, w_t, b, *, out_dtype=None, row_tile=512, col_tile=512):
    """x: (N, in_dim), w_t: (in_dim, out_dim), b: (out_dim,) f32 -> (N, out_dim)."""
    n, in_dim = x.shape
    out_dim = w_t.shape[1]
    out_dtype = out_dtype or x.dtype
    tm = _pick_row_tile(n, row_tile)
    tn = _pick_col_tile(out_dim, col_tile)
    grid = (pl.cdiv(n, tm), pl.cdiv(out_dim, tn))
    return pl.pallas_call(
        _linear_kernel,
        out_shape=jax.ShapeDtypeStruct((n, out_dim), out_dtype),
        grid=grid,
        in_specs=[
            pl.BlockSpec((tm, in_dim), lambda i, j: (i, 0)),
            pl.BlockSpec((in_dim, tn), lambda i, j: (0, j)),
            pl.BlockSpec((1, tn), lambda i, j: (0, j)),
        ],
        out_specs=pl.BlockSpec((tm, tn), lambda i, j: (i, j)),
        compiler_params=pltpu.CompilerParams(
            dimension_semantics=("parallel", "parallel")),
    )(x, w_t, b.reshape(1, out_dim))


# ------------------------- flash-style attention kernel ---------------------

def _flash_attn_kernel(q_ref, k_ref, v_ref, o_ref, m_sc, l_sc, acc_sc, *,
                       num_heads, head_dim, kv_tile, kv_len, approx_recip):
    """Blocks are (1, tq, dim) / (1, tkv, dim); all heads handled in-kernel."""
    kv_i = pl.program_id(2)

    @pl.when(kv_i == 0)
    def _():
        m_sc[...] = jnp.full_like(m_sc, -jnp.inf)
        l_sc[...] = jnp.zeros_like(l_sc)
        acc_sc[...] = jnp.zeros_like(acc_sc)

    q_all = q_ref[0]          # (tq, dim); 1/sqrt(d) already folded into Wq
    k_all = k_ref[0]          # (tkv, dim)
    v_all = v_ref[0]          # (tkv, dim)

    if kv_len is not None:
        # Mask padded kv columns of the (padded-to-tile) sequence.
        col = kv_i * kv_tile + jax.lax.broadcasted_iota(jnp.int32, (1, kv_tile), 1)
        kv_valid = col < kv_len                     # (1, tkv)
    else:
        kv_valid = None

    for h in range(num_heads):                      # static unroll over heads
        sl = slice(h * head_dim, (h + 1) * head_dim)
        qh = q_all[:, sl]
        kh = k_all[:, sl]
        vh = v_all[:, sl]

        # scores: contract on head_dim without transposing K; f32 accumulate.
        s = jax.lax.dot_general(qh, kh, (((1,), (1,)), ((), ())),
                                preferred_element_type=jnp.float32)   # (tq, tkv)
        if kv_valid is not None:
            s = jnp.where(kv_valid, s, jnp.float32(-1e30))

        m_prev = m_sc[h]
        m_new = jnp.maximum(m_prev, jnp.max(s, axis=-1, keepdims=True))
        alpha = jnp.exp(m_prev - m_new)
        p = jnp.exp(s - m_new)
        l_sc[h] = alpha * l_sc[h] + jnp.sum(p, axis=-1, keepdims=True)
        acc_sc[h] = alpha * acc_sc[h] + jnp.dot(
            p.astype(vh.dtype), vh, preferred_element_type=jnp.float32)
        m_sc[h] = m_new

    @pl.when(kv_i == pl.num_programs(2) - 1)
    def _():
        outs = []
        for h in range(num_heads):
            inv_l = pl.reciprocal(l_sc[h], approx=approx_recip)
            outs.append(acc_sc[h] * inv_l)
        # One lane-dense store of width=dim (unmasked vst when dim % 128 == 0).
        o_ref[0] = jnp.concatenate(outs, axis=-1).astype(o_ref.dtype)


def attention(q, k, v, *, num_heads, q_tile=None, kv_tile=None,
              approx_recip=True):
    """q: (b, t_q, dim), k/v: (b, t_kv, dim) -> (b, t_q, dim).

    1/sqrt(head_dim) scaling is expected to be pre-folded into the Q projection.
    """
    b, t_q, dim = q.shape
    t_kv = k.shape[1]
    head_dim = dim // num_heads
    assert head_dim * num_heads == dim

    tq = _round_up(min(q_tile or 256, _round_up(t_q, 8)), 8)
    tkv = _round_up(min(kv_tile or 256, _round_up(t_kv, 8)), 8)

    # Pad-to-tile (masked in-kernel) instead of degenerating to one huge block.
    t_q_p = _round_up(t_q, tq)
    t_kv_p = _round_up(t_kv, tkv)
    if t_q_p != t_q:
        q = jnp.pad(q, ((0, 0), (0, t_q_p - t_q), (0, 0)))
    if t_kv_p != t_kv:
        k = jnp.pad(k, ((0, 0), (0, t_kv_p - t_kv), (0, 0)))
        v = jnp.pad(v, ((0, 0), (0, t_kv_p - t_kv), (0, 0)))

    n_kv = t_kv_p // tkv
    grid = (b, t_q_p // tq, n_kv)

    kernel = functools.partial(
        _flash_attn_kernel, num_heads=num_heads, head_dim=head_dim,
        kv_tile=tkv, kv_len=(t_kv if t_kv_p != t_kv else None),
        approx_recip=approx_recip)

    kv_kwargs = {}
    if n_kv >= 3:
        kv_kwargs["pipeline_mode"] = pl.Buffered(3)   # deeper kv pipelining

    q_spec = pl.BlockSpec((1, tq, dim), lambda bi, qi, ki: (bi, qi, 0))
    kv_spec = pl.BlockSpec((1, tkv, dim), lambda bi, qi, ki: (bi, ki, 0),
                           **kv_kwargs)
    o_spec = pl.BlockSpec((1, tq, dim), lambda bi, qi, ki: (bi, qi, 0))

    out = pl.pallas_call(
        kernel,
        out_shape=jax.ShapeDtypeStruct((b, t_q_p, dim), q.dtype),
        grid=grid,
        in_specs=[q_spec, kv_spec, kv_spec],
        out_specs=o_spec,
        scratch_shapes=[
            pltpu.VMEM((num_heads, tq, 1), jnp.float32),        # running max
            pltpu.VMEM((num_heads, tq, 1), jnp.float32),        # running denom
            pltpu.VMEM((num_heads, tq, head_dim), jnp.float32),  # accumulator
        ],
        compiler_params=pltpu.CompilerParams(
            dimension_semantics=("parallel", "parallel", "arbitrary")),
    )(q, k, v)

    if t_q_p != t_q:
        out = out[:, :t_q, :]
    return out


# ------------------------------ module logic --------------------------------

def prepare_params(params, *, num_heads, compute_dtype=jnp.bfloat16):
    """One-time parameter prep: fuse QKV, pre-transpose, fold 1/sqrt(d), cast."""
    dim = params["wq"].shape[0]
    head_dim = dim // num_heads
    scaling = head_dim ** (-0.5)

    wq_s = params["wq"] * scaling        # fold scaling into Q projection
    bq_s = params["bq"] * scaling

    prep = {
        "wq_t": wq_s.T.astype(compute_dtype),
        "bq": bq_s.astype(jnp.float32),
        "wk_t": params["wk"].T.astype(compute_dtype),
        "bk": params["bk"].astype(jnp.float32),
        "wv_t": params["wv"].T.astype(compute_dtype),
        "bv": params["bv"].astype(jnp.float32),
        "wo_t": params["wo"].T.astype(compute_dtype),
        "bo": params["bo"].astype(jnp.float32),
    }
    if params["wk"].shape[1] == dim and params["wv"].shape[1] == dim:
        w_qkv = jnp.concatenate([wq_s, params["wk"], params["wv"]], axis=0).T
        b_qkv = jnp.concatenate([bq_s, params["bk"], params["bv"]], axis=0)
        prep["w_qkv_t"] = w_qkv.astype(compute_dtype)       # (dim, 3*dim)
        prep["b_qkv"] = b_qkv.astype(jnp.float32)
    return prep


def multi_head_attention(prepared, query, key=None, value=None, *, num_heads,
                         q_tile=None, kv_tile=None, row_tile=512, col_tile=512):
    """Forward pass of MultiHeadAttention.

    query/key/value: (t, b, dim).  Dropout is declared in __init__ but never
    applied in the PyTorch forward, so it is omitted here too.
    """
    # TODO(synk): key_padding_mask / attention_mask paths not implemented (None only).
    t, b, dim = query.shape
    head_dim = dim // num_heads
    compute_dtype = prepared["wo_t"].dtype
    approx_recip = compute_dtype != jnp.float32
    out_dtype = query.dtype

    self_attn = (key is None or key is query) and (value is None or value is query)

    # Single layout transpose of the activations: (t, b, dim) -> (b, t, dim).
    q_btd = jnp.transpose(query, (1, 0, 2)).astype(compute_dtype)

    if self_attn and "w_qkv_t" in prepared:
        # Fused QKV projection: one tiled matmul against a (dim, 3*dim) weight.
        xqkv = linear(q_btd.reshape(b * t, dim), prepared["w_qkv_t"],
                      prepared["b_qkv"], out_dtype=compute_dtype,
                      row_tile=row_tile, col_tile=col_tile)
        xq, xk, xv = jnp.split(xqkv, 3, axis=-1)
        xq = xq.reshape(b, t, dim)
        xk = xk.reshape(b, t, dim)
        xv = xv.reshape(b, t, dim)
        t_kv = t
    else:
        key = query if key is None else key
        value = query if value is None else value
        t_kv = key.shape[0]
        k_btd = jnp.transpose(key, (1, 0, 2)).astype(compute_dtype)
        v_btd = jnp.transpose(value, (1, 0, 2)).astype(compute_dtype)
        xq = linear(q_btd.reshape(b * t, -1), prepared["wq_t"], prepared["bq"],
                    out_dtype=compute_dtype, row_tile=row_tile,
                    col_tile=col_tile).reshape(b, t, dim)
        xk = linear(k_btd.reshape(b * t_kv, -1), prepared["wk_t"], prepared["bk"],
                    out_dtype=compute_dtype, row_tile=row_tile,
                    col_tile=col_tile).reshape(b, t_kv, dim)
        xv = linear(v_btd.reshape(b * t_kv, -1), prepared["wv_t"], prepared["bv"],
                    out_dtype=compute_dtype, row_tile=row_tile,
                    col_tile=col_tile).reshape(b, t_kv, dim)

    # Flash attention over all heads at once, output lane-dense at width=dim.
    ob = attention(xq, xk, xv, num_heads=num_heads, q_tile=q_tile,
                   kv_tile=kv_tile, approx_recip=approx_recip)   # (b, t, dim)

    out = linear(ob.reshape(b * t, dim), prepared["wo_t"], prepared["bo"],
                 out_dtype=out_dtype, row_tile=row_tile, col_tile=col_tile)
    # (b, t, dim) -> (t, b, dim): the single remaining output transpose.
    return out.reshape(b, t, dim).transpose(1, 0, 2)


# ---------------------------- pure-JAX reference ----------------------------

def reference(params, query, *, num_heads):
    t, b, dim = query.shape
    head_dim = dim // num_heads
    scaling = head_dim ** (-0.5)

    def lin(x, w, bias):
        return jnp.einsum("tbi,oi->tbo", x, w) + bias

    xq = lin(query, params["wq"], params["bq"]).reshape(t, b, num_heads, head_dim)
    xk = lin(query, params["wk"], params["bk"]).reshape(t, b, num_heads, head_dim)
    xv = lin(query, params["wv"], params["bv"]).reshape(t, b, num_heads, head_dim)

    scores = jnp.einsum("sbhd,tbhd->hbst", xq, xk) * scaling
    scores = jax.nn.softmax(scores, axis=-1)
    out = jnp.einsum("hbst,tbhd->sbhd", scores, xv).reshape(t, b, dim)
    return jnp.einsum("tbi,oi->tbo", out, params["wo"]) + params["bo"]


# ---------------------------------- main ------------------------------------

if __name__ == "__main__":
    B, DIM, HEADS = 2, 32, 4

    key0 = jax.random.PRNGKey(0)
    ks = jax.random.split(key0, 9)
    scale = 0.05
    raw = {
        "wq": jax.random.normal(ks[0], (DIM, DIM), jnp.float32) * scale,
        "bq": jax.random.normal(ks[1], (DIM,), jnp.float32) * scale,
        "wk": jax.random.normal(ks[2], (DIM, DIM), jnp.float32) * scale,
        "bk": jax.random.normal(ks[3], (DIM,), jnp.float32) * scale,
        "wv": jax.random.normal(ks[4], (DIM, DIM), jnp.float32) * scale,
        "bv": jax.random.normal(ks[5], (DIM,), jnp.float32) * scale,
        "wo": jax.random.normal(ks[6], (DIM, DIM), jnp.float32) * scale,
        "bo": jax.random.normal(ks[7], (DIM,), jnp.float32) * scale,
    }

    # --- Test 1: default bf16 MXU path; T=32 with 8-wide tiles so the multi-
    # step flash reduction and the Buffered(3) kv pipeline are exercised. -----
    T1 = 32
    query1 = jax.random.normal(ks[8], (T1, B, DIM), jnp.float32)
    ref1 = reference(raw, query1, num_heads=HEADS)

    prep_bf16 = prepare_params(raw, num_heads=HEADS, compute_dtype=jnp.bfloat16)
    out1 = multi_head_attention(prep_bf16, query1, num_heads=HEADS,
                                q_tile=8, kv_tile=8, row_tile=16)
    out1 = jax.block_until_ready(out1)
    assert out1.shape == (T1, B, DIM), out1.shape
    err1 = float(jnp.max(jnp.abs(out1 - ref1)))
    assert err1 < 2e-2, err1          # bf16 operands, f32 accumulation

    # --- Test 2: f32 path with a ragged sequence length; exercises the
    # pad-to-tile + kv-masking path at strict tolerance. ----------------------
    T2 = 13
    query2 = query1[:T2]
    ref2 = reference(raw, query2, num_heads=HEADS)

    prep_f32 = prepare_params(raw, num_heads=HEADS, compute_dtype=jnp.float32)
    out2 = multi_head_attention(prep_f32, query2, num_heads=HEADS,
                                q_tile=8, kv_tile=8, row_tile=16)
    out2 = jax.block_until_ready(out2)
    assert out2.shape == (T2, B, DIM), out2.shape
    err2 = float(jnp.max(jnp.abs(out2 - ref2)))
    assert err2 < 1e-4, err2

    print("KERNEL_OK")
</pallas_src>

<mosaic_0001>
module attributes {stable_mosaic.version = 11 : i64} {
  func.func @_linear_kernel(%arg0: i32, %arg1: i32, %arg2: memref<16x32xbf16, #tpu.memory_space<vmem>>, %arg3: memref<32x96xbf16, #tpu.memory_space<vmem>>, %arg4: memref<1x96xf32, #tpu.memory_space<vmem>>, %arg5: memref<16x96xbf16, #tpu.memory_space<vmem>>) attributes {dimension_semantics = [#tpu.dimension_semantics<parallel>, #tpu.dimension_semantics<parallel>], iteration_bounds = array<i64: 4, 1>, scalar_prefetch = 0 : i64, scratch_operands = 0 : i64, tpu.core_type = #tpu.core_type<tc>, window_params = [{transform_indices = @transform_0, window_bounds = array<i64: 16, 32>}, {transform_indices = @transform_1, window_bounds = array<i64: 32, 96>}, {transform_indices = @transform_2, window_bounds = array<i64: 1, 96>}, {transform_indices = @transform_3, window_bounds = array<i64: 16, 96>}]} {
    %c0 = arith.constant 0 : index
    %c0_0 = arith.constant 0 : index
    %0 = vector.load %arg2[%c0, %c0_0] : memref<16x32xbf16, #tpu.memory_space<vmem>>, vector<16x32xbf16>
    %c0_1 = arith.constant 0 : index
    %c0_2 = arith.constant 0 : index
    %1 = vector.load %arg3[%c0_1, %c0_2] : memref<32x96xbf16, #tpu.memory_space<vmem>>, vector<32x96xbf16>
    %cst = arith.constant dense<0.000000e+00> : vector<16x96xf32>
    %2 = tpu.matmul %0, %1, %cst {dimension_numbers = #tpu.dot_dimension_numbers<[1], [0], [0], [1], [0, 0, 1, 1], [], []>} : vector<16x32xbf16>, vector<32x96xbf16>, vector<16x96xf32> -> vector<16x96xf32>
    %c0_3 = arith.constant 0 : index
    %c0_4 = arith.constant 0 : index
    %3 = vector.load %arg4[%c0_3, %c0_4] : memref<1x96xf32, #tpu.memory_space<vmem>>, vector<1x96xf32>
    %4 = vector.broadcast %3 : vector<1x96xf32> to vector<16x96xf32>
    %5 = arith.addf %2, %4 : vector<16x96xf32>
    %6 = arith.truncf %5 : vector<16x96xf32> to vector<16x96xbf16>
    %c0_5 = arith.constant 0 : index
    %c0_6 = arith.constant 0 : index
    %7 = vector.load %arg5[%c0_5, %c0_6] : memref<16x96xbf16, #tpu.memory_space<vmem>>, vector<16x96xbf16>
    tpu.vector_store %arg5[%c0_5, %c0_6], %6 {strides = array<i32>} : memref<16x96xbf16, #tpu.memory_space<vmem>>, vector<16x96xbf16>,
    return
  }
  func.func @transform_0(%arg0: i32, %arg1: i32) -> (i32, i32) {
    %c0_i32 = arith.constant 0 : i32
    %c0_i32_0 = arith.constant 0 : i32
    return %arg0, %c0_i32 : i32, i32
  }
  func.func @transform_1(%arg0: i32, %arg1: i32) -> (i32, i32) {
    %c0_i32 = arith.constant 0 : i32
    %c0_i32_0 = arith.constant 0 : i32
    return %c0_i32, %arg1 : i32, i32
  }
  func.func @transform_2(%arg0: i32, %arg1: i32) -> (i32, i32) {
    %c0_i32 = arith.constant 0 : i32
    %c0_i32_0 = arith.constant 0 : i32
    return %c0_i32, %arg1 : i32, i32
  }
  func.func @transform_3(%arg0: i32, %arg1: i32) -> (i32, i32) {
    %c0_i32 = arith.constant 0 : i32
    return %arg0, %arg1 : i32, i32
  }
}

</mosaic_0001>

<bundles_post_ra>
// kernel: tpu_custom_call.1
= control target key start
LH: loop header
LB: loop body
LE: loop exit
PB: predicated region body
PF: predicated region fallthrough
CT: control target
= control target key end

     0   :  { %8 = vsyncpa [#allocation3], 0  ;;  %s744_s0 = inlined_call_operand.vmem [shape: bf16[64,32], index: 0, kind: input, shape index: {}]   ;;  %s745_s1 = inlined_call_operand.vmem [shape: bf16[32,96], index: 1, kind: input, shape index: {}]   ;;  %s746_s2 = inlined_call_operand.vmem [shape: f32[1,96], index: 2, kind: input, shape index: {}]   ;;  %s747_s3 = inlined_call_operand.hbm [shape: bf16[64,96], index: 3, kind: output, shape index: {}]  }
   0x1   :  { %10 = vsyncpa [#allocation3 + $0x1], 0  ;;  %s621_s12 = smov 0   ;;  %s623_s13 = smov 0  }
   0x2   :  { %s625_s14 = smov 0   ;;  %s627_s15 = smov 0  }
   0x3   :  { %s629_s16 = smov 0   ;;  %s631_s17 = smov 0  }
   0x4 LB: > { %s418_s18 = sadd.s32 4294967295, %s594_s17   ;;  %s419_s19 = sadd.s32 4294967294, %s594_s17   ;;  %s594_s17 = sphi %s631_s17, %s16_s17   ;;  %s590_s16 = sphi %s629_s16, %s754_s16   ;;  %s586_s15 = sphi %s627_s15, %s753_s15   ;;  %s582_s14 = sphi %s625_s14, %s752_s14   ;;  %s578_s13 = sphi %s623_s13, %s751_s13   ;;  %s574_s12 = sphi %s621_s12, %s750_s12  }
   0x5   : > { %s28_s20 = sadd.s32 1, %s590_s16  ;;  %s115_s21 = sadd.s32 1, %s582_s14 }
   0x6   : > { %p30_p0 = scmp.ge.s32.totalorder %s28_s20, 4  ;;  %p125_p1 = scmp.ne.s32.totalorder %s582_s14, %s578_s13 }
   0x7   : > { %p126_p2 = scmp.eq.s32.totalorder %s418_s18, 3  ;;  %p131_p3 = scmp.ne.s32.totalorder %s578_s13, %s574_s12 }
   0x8   : > { %s756_s20 = smov (%p30_p0, %s28_s20), 0  ;;  %p132_p5 = scmp.eq.s32.totalorder %s419_s19, 3 }
   0x9   : > { %p661_p4 = por %p126_p2, %p125_p1  ;;  %s110_s23 = ssub.s32 %s590_s16, %s756_s20 }
   0xa   : > { %p424_p6 = scmp.ge.s32.totalorder %s594_s17, 1  ;;  %p113_p7 = scmp.eq.s32.totalorder %s110_s23, 0 }
   0xb   : > { %p668_p8 = por %p132_p5, %p131_p3  ;;  %p172_p9 = scmp.lt.s32.totalorder %s594_s17, 5 }
   0xc   : > { %s674_s25 = scalar_select %p113_p7, %s582_s14, %s115_s21  }
   0xd   : > { %p173_p10 = pnand %p424_p6, %p172_p9 }
   0xe   : > { %v513_v0 = vld [vmem:[%s745_s1] sm:$0xff] (!%p173_p10)   ;;  %v596_v1 = vmov (!%p173_p10), 0.0   ;;  %v514_v2 = vld [vmem:[%s745_s1 + $0x8] sm:$0xff] (!%p173_p10)   ;;  %vm597_vm0 = vmmov (!%p173_p10), 0   ;;  %s426_s30 = sshll.u32 (!%p173_p10), %s586_s15, 1  ;;  %vm248_vm1 = vcmask (!%p173_p10), 261120  }
   0xf   : > { %176 = sbr.rel (%p173_p10) target bundleno = 259 (0x103), region = 32  ;;  %446 = vmatprep.subr.bf16.mxu0 (!%p173_p10), %v596_v1  ;;  %450 = vmatprep.mubr.msk.bf16.mxu0 (!%p173_p10), %vm597_vm0, %v596_v1  ;;  %p204_p11 = scmp.lt.s32.totalorder (!%p173_p10), %s426_s30, 7  ;;  %v428_v4 = vld [vmem:[%s746_s2] ss:$0 sm:$0xff] (!%p173_p10)  ;;  %vm301_vm2 = vcmask (!%p173_p10), 781312  }
  0x10   : > { %447 = vmatpush3.bf16.msra.mxu0 (!%p173_p10), %v513_v0  ;;  %s200_s8 = sand.u32 (!%p173_p10), 1, %s578_s13   ;;  %s442_s21 = sshll.u32 (!%p173_p10), %s586_s15, 7 }
  0x11   : > { %448 = vmatprep.subr.bf16.mxu0 (!%p173_p10), %v596_v1  ;;  %s425_s9 = sshll.u32 (!%p173_p10), %s200_s8, 3  ;;  %s696_s27 = scalar_lea.hbm (!%p173_p10), %s747_s3, %s442_s21 }
  0x12   : > { %s202_s18 = scalar_lea.vmem (!%p173_p10), [#allocation2], %s425_s9  ;;  %s698_s28 = scalar_lea.sflag (!%p173_p10), [#allocation3], %s200_s8 }
  0x13   : > { %s319_s19 = sshll.u32 (!%p173_p10), %s202_s18, 4  ;;  %s598_s29 = smov (!%p173_p10), [#allocation2]   ;;  %s691_s19 = int_to_ptr.vmem [resolvable:$true] %s319_s19 }
  0x14   : > { %449 = vmatpush3.bf16.msra.mxu0 (!%p173_p10), %v514_v2  ;;  %s516_s15 = scalar_lea.vmem (!%p173_p10), %s691_s19, 128 }
  0x15   : > { %p517_p12 = scmp.ne.s32.totalorder (!%p173_p10), %s691_s19, %s516_s15 }
  0x16   : > { %s758_s30 = smov (!%p204_p11, %s426_s30), 7 }
  0x17   : > { %s427_s4 = sshll.u32 %s758_s30, 2  ;;  %p518_p13 = pnand %p517_p12, %p661_p4 }
  0x18   : > { %s207_s7 = scalar_lea.vmem %s744_s0, %s427_s4  ;;  %s520_s30 = sshll.u32 %s598_s29, 4  ;;  %s521_s30 = int_to_ptr.vmem [resolvable:$false] %s520_s30 }
  0x19   : > { %v515_v3 = vld [vmem:[%s207_s7] sm:$0xff]   ;;  %p519_p0 = pneg %p518_p13  ;;  %s522_s4 = scalar_lea.vmem %s521_s30, 256 }
  0x1a   : > { %451 = vmatmul.mubr.msk.bf16.vlgmr.msra.gmra.mrb[0].mxu0 %vm248_vm1, %v515_v3  ;;  %p523_p1 = scmp.lt.s32.totalorder %s691_s19, %s521_s30  ;;  %p524_p2 = scmp.lt.s32.totalorder %s522_s4, %s516_s15 }
  0x1c   : > { %p525_p3 = por %p524_p2, %p523_p1 }
  0x1e   : > { %p526_p5 = pnand %p525_p3, %p519_p0 }
  0xed   : > { %v286_v5 = vpop.f32.mrb[0].mxu0 }
  0xee   : > { %v287_v6 = vadd.f32 %v428_v4, %v286_v5  ;;  %v452_v7 = vpop.f32.mrb[1].mxu0 }
  0xef   : > { %v289_v8 = vpop.f32.mrb[2].mxu0 }
  0xf0   : > { %v440_v9 = vpack.c.bf16 %v287_v6, %v287_v6  ;;  %v290_v10 = vadd.f32 %v428_v4, %v289_v8  ;;  %v453_v11 = vpop.f32.mrb[3].mxu0 }
  0xf2   : > { %302 = vst.msk [vmem:[%s202_s18] sm:$0xf] %vm301_vm2, %v440_v9  ;;  %v441_v12 = vpack.c.bf16 %v290_v10, %v290_v10 }
  0xf4   : > { %303 = vst.msk [vmem:[%s202_s18 + $0x4] sm:$0xf] %vm301_vm2, %v441_v12 }
  0xf5   : > { %529 = shalt.err (!%p526_p5)
}
  0xf6   : > { %s530_s5 = scalar_lea.hbm %s696_s27, 128  ;;  %s534_s8 = scalar_lea.hbm %s747_s3, 512 }
  0xf7   : > { %p531_p6 = scmp.ne.s32.totalorder %s696_s27, %s530_s5  ;;  %p535_p10 = scmp.lt.u32.totalorder %s696_s27, %s747_s3 }
  0xf8   : > { %p536_p11 = scmp.lt.u32.totalorder %s534_s8, %s530_s5  ;;  %p538_p13 = scmp.lt.u32.totalorder %s530_s5, %s696_s27 }
  0xf9   : > { %p532_p7 = pnand %p531_p6, %p661_p4 }
  0xfa   : > { %p537_p12 = por %p536_p11, %p535_p10 }
  0xfb   : > { %p533_p9 = pneg %p532_p7 }
  0xfc   : > { %p539_p0 = por %p538_p13, %p537_p12 }
  0xfe   : > { %p540_p1 = pnand %p539_p0, %p533_p9 }
 0x100   : > { %543 = shalt.err (!%p540_p1)
}
 0x101   : > { %s599_s11 = smov 64   ;;  %s600_s18 = smov 4  }
 0x102   : > { %454 = dma.vmem_to_hbm [thread:$0]  (%p661_p4), %s691_s19, 128, %s696_s27, %s698_s28, %s599_s11, %s599_s11, %s600_s18  }
 0x103 PF: > { %p460_p2 = scmp.ge.s32.totalorder %s594_s17, 2  ;;  %s334_s21 = sand.u32 1, %s574_s12  }
 0x104   : > { %s335_s23 = scalar_lea.sflag [#allocation3], %s334_s21 }
 0x105   : > { %p457_p3 = pnand %p460_p2, %p668_p8 }
 0x107   : > { %569 = dma.done.wait (!%p457_p3), %s335_s23, 128  }
 0x108   : > { %571 = vsyncadd (!%p457_p3), %s335_s23, 4294967168  ;;  %s16_s17 = sadd.s32 1, %s594_s17   ;;  %s750_s12 = smov %s578_s13 }
 0x109   : > { %p13_p5 = scmp.ge.s32.totalorder %s16_s17, 6   ;;  %s751_s13 = smov %s582_s14 }
 0x10a   : > { %s752_s14 = smov %s674_s25  ;;  %s753_s15 = smov %s590_s16 }
 0x10b   : > { %s754_s16 = smov %s756_s20  ;;  %15 = sbr.rel (!%p13_p5) target bundleno = 4 (0x4), region = 73 }
 0x112   :  { %340 = vsyncpa [#allocation3], 1 }
 0x113   :  { %342 = vsyncpa [#allocation3 + $0x1], 1 }

</bundles_post_ra>
